<compile_context>
chip_gen: v7x
topology: tpu7x:2x2x1
jax: 0.10.0
libtpu: 0.0.40
codegen_flags: <defaults>
</compile_context>

<pallas_src>
import jax
import jax.numpy as jnp
from jax.experimental import pallas as pl
from jax.experimental.pallas import tpu as pltpu


def _similarity_kernel(c_ref, lhs_ref, hpT_ref, w2_ref, b2_ref, out_ref):
    D = hpT_ref.shape[0]
    c = c_ref[...]                                                  # (TN, D) natural layout

    # Fused MXU pass over the tile (contract the shared D axis of both operands):
    #   rows 0..D-1 -> (c @ W1c)^T   (attention MLP pre-activation, transposed)
    #   row  D      -> p_n . c       (cosine numerator, product pre-normalized)
    big = jax.lax.dot_general(
        lhs_ref[...], c,
        dimension_numbers=(((1,), (1,)), ((), ())),
        preferred_element_type=jnp.float32)                         # (D+8, TN)

    # ---- attention MLP: Linear(2D->D) + ReLU + Linear(D->1) + Sigmoid ----
    h = jnp.maximum(big[:D, :] + hpT_ref[...], 0.0)                 # (D, TN)
    logits = jnp.dot(w2_ref[...], h, preferred_element_type=jnp.float32)  # (1, TN)
    att = jax.nn.sigmoid(logits + b2_ref[0, 0])                     # (1, TN)

    # ---- cosine similarity ----
    dot = big[D:D + 1, :]                                           # (1, TN)
    ones = jnp.ones((1, D), jnp.float32)
    csq = jax.lax.dot_general(                                      # sum_d c[n,d]^2, lane-dense
        ones, c * c,
        dimension_numbers=(((1,), (1,)), ((), ())),
        preferred_element_type=jnp.float32)                         # (1, TN)
    eps = jnp.float32(1e-8)
    inv_c_norm = jax.lax.rsqrt(jnp.maximum(csq, eps * eps))         # 1 / max(||c||, eps)

    out_ref[...] = dot * inv_c_norm * att                           # (1, TN)


def product_similarity(product_embedding, candidate_embeddings, params, *, tn=None):
    """product_embedding: (D,), candidate_embeddings: (N, D) -> (N,)"""
    f32 = jnp.float32
    D = product_embedding.shape[0]
    N = candidate_embeddings.shape[0]

    p = product_embedding.reshape(1, D)
    p = p if p.dtype == f32 else p.astype(f32)
    c = candidate_embeddings
    c = c if c.dtype == f32 else c.astype(f32)

    w1p, w1c, b1, w2, b2 = params

    # ---- grid-invariant product-side work (tiny, D^2-sized) ----
    h_pT = (p @ w1p + b1).T                                  # (D, 1): (p @ W1p + b1)^T
    p_norm = jnp.sqrt(jnp.sum(p * p))
    p_n = (p / jnp.maximum(p_norm, f32(1e-8)))[0]            # (D,) pre-normalized product
    R = D + 8                                                # pad stacked rows to sublane multiple
    stacked = jnp.zeros((R, D), f32).at[:D, :].set(w1c.T).at[D, :].set(p_n)

    # ---- candidate tile selection ----
    lane = 128
    n_up = pl.cdiv(max(N, 1), lane) * lane
    if tn is None:
        tn = max(lane, ((2 * 2**20) // (4 * D) // lane) * lane)   # ~2 MiB of streamed bytes/step
    tn = max(lane, (tn // lane) * lane)
    tn = min(tn, n_up)
    if n_up >= 2 * lane:                                     # keep grid >= 2 (v7x: 2 TensorCores)
        half = pl.cdiv(pl.cdiv(N, 2), lane) * lane
        tn = min(tn, max(lane, half))

    try:
        vmem_cap = int(pltpu.get_tpu_info().vmem_capacity_bytes)
    except Exception:
        vmem_cap = 64 * 2**20                                # v7x-safe fallback

    Dp = pl.cdiv(D, lane) * lane                             # lane-padded minor dim for estimates

    def est_vmem(t):
        # double-buffered candidate block + c^2 temp (lane-padded), big/h temps,
        # small (1, t) rows, double-buffered output, invariants.
        return 4 * (3 * t * Dp + (R + D + 16) * t + 2 * t) + 4 * (2 * R * D + 8 * D)

    budget = int(0.40 * vmem_cap)
    while tn > lane and est_vmem(tn) > budget:
        tn = max(lane, (tn // 2 // lane) * lane)

    grid_n = pl.cdiv(N, tn)
    n_out = grid_n * tn
    vmem_limit = int(min(0.75 * vmem_cap, max(2 * est_vmem(tn), 24 * 2**20)))

    out = pl.pallas_call(
        _similarity_kernel,
        out_shape=jax.ShapeDtypeStruct((1, n_out), f32),
        grid_spec=pltpu.PrefetchScalarGridSpec(
            num_scalar_prefetch=0,
            grid=(grid_n,),
            in_specs=[
                pl.BlockSpec((tn, D), lambda i: (i, 0)),     # candidates, natural (N, D) layout
                pl.BlockSpec((R, D), lambda i: (0, 0)),      # [W1c^T ; p_n ; 0-pad]
                pl.BlockSpec((D, 1), lambda i: (0, 0)),      # (p @ W1p + b1)^T
                pl.BlockSpec((1, D), lambda i: (0, 0)),      # w2
                pl.BlockSpec(memory_space=pltpu.MemorySpace.SMEM),  # b2 scalar
            ],
            out_specs=pl.BlockSpec((1, tn), lambda i: (0, i)),
        ),
        compiler_params=pltpu.CompilerParams(
            dimension_semantics=("parallel",),
            vmem_limit_bytes=vmem_limit),
    )(c, stacked, h_pT, w2, b2)
    return out[0, :N]


def init_params(key, embedding_dim):
    """Deterministic synthetic parameters for the attention MLP."""
    D = embedding_dim
    k1, k2, k3, k4 = jax.random.split(key, 4)
    # nn.Linear(2D, D): weight (D, 2D). Store transposed & split into two (D, D) halves.
    w1_t = 0.1 * jax.random.normal(k1, (2 * D, D), jnp.float32)   # == W1.T
    w1p = w1_t[:D, :]
    w1c = w1_t[D:, :]
    b1 = 0.1 * jax.random.normal(k2, (1, D), jnp.float32)
    # nn.Linear(D, 1): weight (1, D), bias (1,)
    w2 = 0.1 * jax.random.normal(k3, (1, D), jnp.float32)
    b2 = 0.1 * jax.random.normal(k4, (1, 1), jnp.float32)
    return (w1p, w1c, b1, w2, b2)


def _reference(product_embedding, candidate_embeddings, params):
    """Pure-JAX reference mirroring the PyTorch forward."""
    w1p, w1c, b1, w2, b2 = params
    p = product_embedding.reshape(1, -1)
    c = candidate_embeddings
    pe = jnp.broadcast_to(p, c.shape)
    combined = jnp.concatenate([pe, c], axis=1)
    w1_t = jnp.concatenate([w1p, w1c], axis=0)
    h = jax.nn.relu(combined @ w1_t + b1)
    att = jax.nn.sigmoid(jnp.sum(h * w2, axis=1) + b2[0, 0])
    eps = 1e-8
    dot = jnp.sum(pe * c, axis=1)
    cos = dot / (jnp.maximum(jnp.linalg.norm(p), eps) *
                 jnp.maximum(jnp.linalg.norm(c, axis=1), eps))
    return cos * att


if __name__ == "__main__":
    embedding_dim = 32
    num_candidates = 8

    key = jax.random.PRNGKey(0)
    kp, kc, kw = jax.random.split(key, 3)
    product = jax.random.normal(kp, (embedding_dim,), jnp.float32)
    candidates = jax.random.normal(kc, (num_candidates, embedding_dim), jnp.float32)
    params = init_params(kw, embedding_dim)

    sims = jax.block_until_ready(product_similarity(product, candidates, params))
    ref = _reference(product, candidates, params)
    assert sims.shape == (num_candidates,)
    assert jnp.allclose(sims, ref, atol=1e-5, rtol=1e-5), (sims, ref)

    # Extra check: multi-block grid with a ragged final tile.
    n2 = 300
    candidates2 = jax.random.normal(kc, (n2, embedding_dim), jnp.float32)
    sims2 = jax.block_until_ready(product_similarity(product, candidates2, params))
    ref2 = _reference(product, candidates2, params)
    assert sims2.shape == (n2,)
    assert jnp.allclose(sims2, ref2, atol=1e-5, rtol=1e-5)

    print("KERNEL_OK")
</pallas_src>

<mosaic_0001>
module attributes {stable_mosaic.version = 11 : i64} {
  func.func @_similarity_kernel(%arg0: i32, %arg1: memref<128x32xf32, #tpu.memory_space<vmem>>, %arg2: memref<40x32xf32, #tpu.memory_space<vmem>>, %arg3: memref<32x1xf32, #tpu.memory_space<vmem>>, %arg4: memref<1x32xf32, #tpu.memory_space<vmem>>, %arg5: memref<1x1xf32, #tpu.memory_space<smem>>, %arg6: memref<1x128xf32, #tpu.memory_space<vmem>>) attributes {dimension_semantics = [#tpu.dimension_semantics<parallel>], iteration_bounds = array<i64: 1>, scalar_prefetch = 0 : i64, scratch_operands = 0 : i64, tpu.core_type = #tpu.core_type<tc>, window_params = [{transform_indices = @transform_0, window_bounds = array<i64: 128, 32>}, {pipeline_mode = #tpu.pipeline_mode<synchronous>, transform_indices = @transform_1, window_bounds = array<i64: 40, 32>}, {pipeline_mode = #tpu.pipeline_mode<synchronous>, transform_indices = @transform_2, window_bounds = array<i64: 32, 1>}, {pipeline_mode = #tpu.pipeline_mode<synchronous>, transform_indices = @transform_3, window_bounds = array<i64: 1, 32>}, {transform_indices = @transform_4, window_bounds = array<i64: 1, 1>}, {transform_indices = @transform_5, window_bounds = array<i64: 1, 128>}]} {
    %c0 = arith.constant 0 : index
    %c0_0 = arith.constant 0 : index
    %0 = vector.load %arg1[%c0, %c0_0] : memref<128x32xf32, #tpu.memory_space<vmem>>, vector<128x32xf32>
    %c0_1 = arith.constant 0 : index
    %c0_2 = arith.constant 0 : index
    %1 = vector.load %arg2[%c0_1, %c0_2] : memref<40x32xf32, #tpu.memory_space<vmem>>, vector<40x32xf32>
    %cst = arith.constant dense<0.000000e+00> : vector<40x128xf32>
    %2 = tpu.matmul %1, %0, %cst {dimension_numbers = #tpu.dot_dimension_numbers<[1], [1], [0], [0], [0, 0, 1, 0], [], []>} : vector<40x32xf32>, vector<128x32xf32>, vector<40x128xf32> -> vector<40x128xf32>
    %3 = vector.extract_strided_slice %2 {offsets = [0, 0], sizes = [32, 128], strides = [1, 1]} : vector<40x128xf32> to vector<32x128xf32>
    %c0_3 = arith.constant 0 : index
    %c0_4 = arith.constant 0 : index
    %4 = vector.load %arg3[%c0_3, %c0_4] : memref<32x1xf32, #tpu.memory_space<vmem>>, vector<32x1xf32>
    %5 = vector.broadcast %4 : vector<32x1xf32> to vector<32x128xf32>
    %6 = arith.addf %3, %5 : vector<32x128xf32>
    %cst_5 = arith.constant 0.000000e+00 : f32
    %7 = vector.broadcast %cst_5 : f32 to vector<32x128xf32>
    %8 = arith.maximumf %6, %7 : vector<32x128xf32>
    %c0_6 = arith.constant 0 : index
    %c0_7 = arith.constant 0 : index
    %9 = vector.load %arg4[%c0_6, %c0_7] : memref<1x32xf32, #tpu.memory_space<vmem>>, vector<1x32xf32>
    %cst_8 = arith.constant dense<0.000000e+00> : vector<1x128xf32>
    %10 = tpu.matmul %9, %8, %cst_8 {dimension_numbers = #tpu.dot_dimension_numbers<[1], [0], [0], [1], [0, 0, 1, 1], [], []>} : vector<1x32xf32>, vector<32x128xf32>, vector<1x128xf32> -> vector<1x128xf32>
    %c0_9 = arith.constant 0 : index
    %c0_10 = arith.constant 0 : index
    %11 = memref.load %arg5[%c0_9, %c0_10] : memref<1x1xf32, #tpu.memory_space<smem>>
    %12 = vector.broadcast %11 : f32 to vector<1x128xf32>
    %13 = arith.addf %10, %12 : vector<1x128xf32>
    %14 = arith.negf %13 : vector<1x128xf32>
    %15 = math.exp %14 : vector<1x128xf32>
    %cst_11 = arith.constant 1.000000e+00 : f32
    %16 = vector.broadcast %cst_11 : f32 to vector<1x128xf32>
    %17 = arith.addf %16, %15 : vector<1x128xf32>
    %18 = arith.divf %16, %17 : vector<1x128xf32>
    %19 = vector.extract_strided_slice %2 {offsets = [32, 0], sizes = [1, 128], strides = [1, 1]} : vector<40x128xf32> to vector<1x128xf32>
    %cst_12 = arith.constant 1.000000e+00 : f32
    %20 = vector.broadcast %cst_12 : f32 to vector<1x32xf32>
    %21 = arith.mulf %0, %0 : vector<128x32xf32>
    %cst_13 = arith.constant dense<0.000000e+00> : vector<1x128xf32>
    %22 = tpu.matmul %20, %21, %cst_13 {dimension_numbers = #tpu.dot_dimension_numbers<[1], [1], [0], [0], [0, 0, 1, 0], [], []>} : vector<1x32xf32>, vector<128x32xf32>, vector<1x128xf32> -> vector<1x128xf32>
    %cst_14 = arith.constant 9.99999993E-9 : f32
    %cst_15 = arith.constant 9.99999993E-9 : f32
    %23 = arith.mulf %cst_14, %cst_15 : f32
    %24 = vector.broadcast %23 : f32 to vector<1x128xf32>
    %25 = arith.maximumf %22, %24 : vector<1x128xf32>
    %26 = math.rsqrt %25 : vector<1x128xf32>
    %27 = arith.mulf %19, %26 : vector<1x128xf32>
    %28 = arith.mulf %27, %18 : vector<1x128xf32>
    %c0_16 = arith.constant 0 : index
    %c0_17 = arith.constant 0 : index
    %29 = vector.load %arg6[%c0_16, %c0_17] : memref<1x128xf32, #tpu.memory_space<vmem>>, vector<1x128xf32>
    tpu.vector_store %arg6[%c0_16, %c0_17], %28 {strides = array<i32>} : memref<1x128xf32, #tpu.memory_space<vmem>>, vector<1x128xf32>,
    return
  }
  func.func @transform_0(%arg0: i32) -> (i32, i32) {
    %c0_i32 = arith.constant 0 : i32
    %c0_i32_0 = arith.constant 0 : i32
    return %arg0, %c0_i32 : i32, i32
  }
  func.func @transform_1(%arg0: i32) -> (i32, i32) {
    %c0_i32 = arith.constant 0 : i32
    %c0_i32_0 = arith.constant 0 : i32
    %c0_i32_1 = arith.constant 0 : i32
    return %c0_i32, %c0_i32_0 : i32, i32
  }
  func.func @transform_2(%arg0: i32) -> (i32, i32) {
    %c0_i32 = arith.constant 0 : i32
    %c0_i32_0 = arith.constant 0 : i32
    %c0_i32_1 = arith.constant 0 : i32
    return %c0_i32, %c0_i32_0 : i32, i32
  }
  func.func @transform_3(%arg0: i32) -> (i32, i32) {
    %c0_i32 = arith.constant 0 : i32
    %c0_i32_0 = arith.constant 0 : i32
    %c0_i32_1 = arith.constant 0 : i32
    return %c0_i32, %c0_i32_0 : i32, i32
  }
  func.func @transform_4(%arg0: i32) -> (i32, i32) {
    %c0_i32 = arith.constant 0 : i32
    %c0_i32_0 = arith.constant 0 : i32
    %c0_i32_1 = arith.constant 0 : i32
    return %c0_i32, %c0_i32_0 : i32, i32
  }
  func.func @transform_5(%arg0: i32) -> (i32, i32) {
    %c0_i32 = arith.constant 0 : i32
    %c0_i32_0 = arith.constant 0 : i32
    return %c0_i32, %arg0 : i32, i32
  }
}

</mosaic_0001>

<bundles_post_ra>
// kernel: tpu_custom_call.1
= control target key start
LH: loop header
LB: loop body
LE: loop exit
PB: predicated region body
PF: predicated region fallthrough
CT: control target
= control target key end

     0   :  { %vm43_vm0 = vcmask 261120   ;;  %v751_v3 = vmov 0.0|0.0   ;;  %vm752_vm2 = vmmov 0   ;;  %v753_v28 = vmov 0.0   ;;  %s1029_s0 = inlined_call_operand.vmem [shape: f32[8,32], index: 0, kind: input, shape index: {}]   ;;  %s1030_s1 = inlined_call_operand.vmem [shape: f32[40,32], index: 1, kind: input, shape index: {}]   ;;  %s1031_s2 = inlined_call_operand.vmem [shape: f32[32,1], index: 2, kind: input, shape index: {}]   ;;  %s1032_s3 = inlined_call_operand.vmem [shape: f32[1,32], index: 3, kind: input, shape index: {}]   ;;  %s1033_s4 = inlined_call_operand.<no memory space> [shape: f32[1,1], index: 4, kind: input, shape index: {}]   ;;  %s1034_s5 = inlined_call_operand.hbm [shape: f32[1,128], index: 5, kind: output, shape index: {}]  }
   0x1   :  { %v22_v0 = vld [vmem:[%s1029_s0] sm:$0xff]  ;;  %v23_v1 = vld [vmem:[%s1029_s0 + $0x8] sm:$0xff]  ;;  %v24_v2 = vld [vmem:[%s1029_s0 + $0x10] sm:$0xff]  ;;  %643 = vmatprep.subr.bf16.mxu0 %v751_v3  ;;  %675 = vmatprep.subr.bf16.mxu1 %v751_v3 }
   0x2   :  { %v644_v4 = vpack.c.bf16 %v23_v1, %v22_v0  ;;  %vm799_vm1 = vmpackc.low %vm43_vm0, %vm43_vm0  ;;  %v803_v6 = vmul.f32 %v22_v0, %v22_v0  ;;  %v805_v7 = vmul.f32 %v23_v1, %v23_v1  ;;  %v25_v8 = vld [vmem:[%s1029_s0 + $0x18] sm:$0xff]  ;;  %v810_v9 = vmul.f32 %v24_v2, %v24_v2  ;;  %v26_v10 = vld [vmem:[%s1029_s0 + $0x20] sm:$0xff]  ;;  %582 = vmatprep.mubr.msk.f32.mxu0 %vm752_vm2, %v753_v28 }
   0x3   :  { %v815_v11 = vmul.f32 %v25_v8, %v25_v8  ;;  %v27_v12 = vld [vmem:[%s1029_s0 + $0x28] sm:$0xff]  ;;  %v820_v13 = vmul.f32 %v26_v10, %v26_v10  ;;  %v28_v16 = vld [vmem:[%s1029_s0 + $0x30] sm:$0xff]  ;;  %v29_v17 = vld [vmem:[%s1029_s0 + $0x38] sm:$0xff]  ;;  %605 = vmatprep.mubr.msk.f32.mxu1 %vm752_vm2, %v753_v28  ;;  %v648_v35 = vpack.c.bf16 %v25_v8, %v24_v2 }
   0x4   :  { %646 = vmatpush3.bf16.xpose.msk.msra.mxu0 %vm799_vm1, %v644_v4  ;;  %v682_v14 = vpack.c.bf16 %v805_v7, %v803_v6  ;;  %v827_v15 = vmul.f32 %v27_v12, %v27_v12  ;;  %v838_v19 = vmul.f32 %v28_v16, %v28_v16  ;;  %v840_v20 = vmul.f32 %v29_v17, %v29_v17  ;;  %v30_v21 = vld [vmem:[%s1029_s0 + $0x40] sm:$0xff]  ;;  %v31_v22 = vld [vmem:[%s1029_s0 + $0x48] sm:$0xff]  ;;  %v32_v26 = vld [vmem:[%s1029_s0 + $0x50] sm:$0xff] }
   0x5   :  { %647 = vmatprep.subr.bf16.mxu0 %v751_v3  ;;  %v686_v18 = vpack.c.bf16 %v815_v11, %v810_v9  ;;  %v850_v24 = vmul.f32 %v30_v21, %v30_v21  ;;  %v852_v25 = vmul.f32 %v31_v22, %v31_v22  ;;  %v33_v27 = vld [vmem:[%s1029_s0 + $0x58] sm:$0xff]  ;;  %v864_v30 = vmul.f32 %v32_v26, %v32_v26  ;;  %v34_v32 = vld [vmem:[%s1029_s0 + $0x60] sm:$0xff]  ;;  %v35_v33 = vld [vmem:[%s1029_s0 + $0x68] sm:$0xff] }
   0x6   :  { %v690_v23 = vpack.c.bf16 %v827_v15, %v820_v13  ;;  %v694_v29 = vpack.c.bf16 %v840_v20, %v838_v19  ;;  %v866_v31 = vmul.f32 %v33_v27, %v33_v27  ;;  %v36_v34 = vld [vmem:[%s1029_s0 + $0x70] sm:$0xff]  ;;  %v881_v37 = vmul.f32 %v34_v32, %v34_v32  ;;  %v37_v39 = vld [vmem:[%s1029_s0 + $0x78] sm:$0xff]  ;;  %v197_v40 = vld [vmem:[%s1031_s2] sm:$0xff] }
   0x7   :  { %v698_v36 = vpack.c.bf16 %v852_v25, %v850_v24  ;;  %v883_v38 = vmul.f32 %v35_v33, %v35_v33  ;;  %v199_v41 = vld [vmem:[%s1031_s2 + $0x10] sm:$0xff]  ;;  %v896_v43 = vmul.f32 %v36_v34, %v36_v34  ;;  %v898_v44 = vmul.f32 %v37_v39, %v37_v39 }
   0x8   :  { %v702_v42 = vpack.c.bf16 %v866_v31, %v864_v30 }
   0x9   :  { %11 = vsyncpa [#allocation4], 0  ;;  %v706_v45 = vpack.c.bf16 %v883_v38, %v881_v37  ;;  %v754_v46 = vmov 0   ;;  %v710_v47 = vpack.c.bf16 %v898_v44, %v896_v43  ;;  %v198_v48 = vld [vmem:[%s1031_s2 + $0x8] sm:$0xff]  ;;  %v200_v49 = vld [vmem:[%s1031_s2 + $0x18] sm:$0xff]  ;;  %v652_v50 = vpack.c.bf16 %v27_v12, %v26_v10  ;;  %s756_s18 = smov [#allocation3]  }
   0xa   :  { %719 = vset.pattern.permute.xlu0 %v754_v46  ;;  %720 = vset.pattern.permute.xlu1 %v754_v46  ;;  %v656_v51 = vpack.c.bf16 %v29_v17, %v28_v16  ;;  %v660_v52 = vpack.c.bf16 %v31_v22, %v30_v21  ;;  %v664_v53 = vpack.c.bf16 %v33_v27, %v32_v26  ;;  %v38_v56 = vld [vmem:[%s1030_s1] sm:$0xff]  ;;  %v39_v57 = vld [vmem:[%s1030_s1 + $0x8] sm:$0xff]  ;;  %v40_v58 = vld [vmem:[%s1030_s1 + $0x10] sm:$0xff]  ;;  %v755_v6 = vmov 1.0   ;;  %s459_s19 = sshll.u32 %s756_s18, 4  ;;  %s460_s19 = int_to_ptr.vmem [resolvable:$true] %s459_s19 }
   0xb   :  { %203 = vperm.xlu0 %719, %v197_v40   ;;  %213 = vperm.xlu1 %720, %v199_v41   ;;  %v668_v54 = vpack.c.bf16 %v35_v33, %v34_v32  ;;  %v672_v55 = vpack.c.bf16 %v37_v39, %v36_v34  ;;  %v41_v59 = vld [vmem:[%s1030_s1 + $0x18] sm:$0xff]  ;;  %v42_v60 = vld [vmem:[%s1030_s1 + $0x20] sm:$0xff]  ;;  %s727_s20 = scalar_lea.vmem %s460_s19, 16  ;;  %p732_p1 = scmp.lt.s32.totalorder %s460_s19, %s460_s19 }
   0xc   :  { %650 = vmatpush3.bf16.xpose.msk.msra.mxu0 %vm799_vm1, %v648_v35  ;;  %v229_v41 = vld [vmem:[%s1032_s3] sm:$0x1]  ;;  %p728_p0 = scmp.ne.s32.totalorder %s460_s19, %s727_s20 }
   0xd   :  { %651 = vmatprep.subr.bf16.mxu0 %v751_v3 }
   0xf   :  { %208 = vperm.xlu0 %719, %v198_v48   ;;  %218 = vperm.xlu1 %720, %v200_v49  }
  0x14   :  { %654 = vmatpush3.bf16.xpose.msk.msra.mxu0 %vm799_vm1, %v652_v50 }
  0x15   :  { %655 = vmatprep.subr.bf16.mxu0 %v751_v3 }
  0x1c   :  { %658 = vmatpush3.bf16.xpose.msk.msra.mxu0 %vm799_vm1, %v656_v51 }
  0x1d   :  { %659 = vmatprep.subr.bf16.mxu0 %v751_v3 }
  0x24   :  { %662 = vmatpush3.bf16.xpose.msk.msra.mxu0 %vm799_vm1, %v660_v52 }
  0x25   :  { %663 = vmatprep.subr.bf16.mxu0 %v751_v3 }
  0x2c   :  { %666 = vmatpush3.bf16.xpose.msk.msra.mxu0 %vm799_vm1, %v664_v53 }
  0x2d   :  { %667 = vmatprep.subr.bf16.mxu0 %v751_v3 }
  0x34   :  { %670 = vmatpush3.bf16.xpose.msk.msra.mxu0 %vm799_vm1, %v668_v54 }
  0x35   :  { %671 = vmatprep.subr.bf16.mxu0 %v751_v3 }
  0x3c   :  { %674 = vmatpush3.bf16.xpose.msk.msra.mxu0 %vm799_vm1, %v672_v55 }
  0x43   :  { %583 = vmatmul.mubr.msk.f32.vlgmr.msra.gmra.mrb[0].mxu0 %vm43_vm0, %v38_v56 }
  0x44   :  { %585 = vmatprep.mubr.msk.f32.mxu0 %vm752_vm2, %v753_v28 }
  0x47   :  { %586 = vmatmul.mubr.msk.f32.gmra.mrb[2].mxu0 %vm43_vm0, %v39_v57 }
  0x48   :  { %588 = vmatprep.mubr.msk.f32.mxu0 %vm752_vm2, %v753_v28 }
  0x4b   :  { %589 = vmatmul.mubr.msk.f32.gmra.mrb[4].mxu0 %vm43_vm0, %v40_v58 }
  0x4c   :  { %591 = vmatprep.mubr.msk.f32.mxu0 %vm752_vm2, %v753_v28 }
  0x4f   :  { %592 = vmatmul.mubr.msk.f32.gmra.mrb[6].mxu0 %vm43_vm0, %v41_v59 }
  0x50   :  { %594 = vmatprep.mubr.msk.f32.mxu0 %vm752_vm2, %v753_v28 }
  0x53   :  { %595 = vmatmul.mubr.msk.f32.gmra.mrb[8].mxu0 %vm43_vm0, %v42_v60 }
  0x8a   :  { %v204_v61 = vpop.permute.xlu0 %203  ;;  %v214_v10 = vpop.permute.xlu1 %213 }
  0x8e   :  { %v209_v0 = vpop.permute.xlu0 %208  ;;  %v219_v27 = vpop.permute.xlu1 %218 }
 0x116   :  { %v173_v62 = vpop.f32.mrb[0].mxu0 }
 0x117   :  { %v584_v63 = vpop.f32.mrb[1].mxu0  ;;  %v221_v1 = vadd.f32 %v204_v61, %v173_v62 }
 0x119   :  { %v225_v12 = vmax.f32 %v221_v1, 0.0 }
 0x11a   :  { %v178_v2 = vpop.f32.mrb[2].mxu0 }
 0x11b   :  { %v222_v4 = vadd.f32 %v209_v0, %v178_v2  ;;  %v587_v8 = vpop.f32.mrb[3].mxu0 }
 0x11d   :  { %v226_v16 = vmax.f32 %v222_v4, 0.0 }
 0x11e   :  { %v183_v17 = vpop.f32.mrb[4].mxu0 }
 0x11f   :  { %v590_v21 = vpop.f32.mrb[5].mxu0  ;;  %v676_v22 = vpack.c.bf16 %v226_v16, %v225_v12  ;;  %v223_v26 = vadd.f32 %v214_v10, %v183_v17 }
 0x121   :  { %677 = vmatpush3.bf16.msra.mxu1 %v676_v22  ;;  %v227_v35 = vmax.f32 %v223_v26, 0.0 }
 0x122   :  { %v188_v32 = vpop.f32.mrb[6].mxu0  ;;  %678 = vmatprep.subr.bf16.mxu1 %v751_v3 }
 0x123   :  { %v224_v33 = vadd.f32 %v219_v27, %v188_v32  ;;  %v593_v34 = vpop.f32.mrb[7].mxu0 }
 0x125   :  { %v228_v39 = vmax.f32 %v224_v33, 0.0 }
 0x126   :  { %v193_v7 = vpop.f32.mrb[8].mxu0 }
 0x127   :  { %v679_v40 = vpack.c.bf16 %v228_v39, %v227_v35  ;;  %v596_v9 = vpop.f32.mrb[9].mxu0 }
 0x129   :  { %680 = vmatpush3.bf16.msra.mxu1 %v679_v40 }
 0x12a   :  { %681 = vmatprep.subr.bf16.mxu1 %v751_v3 }
 0x12c   :  { %606 = vmatmul.mubr.msk.f32.vlgmr.msra.gmra.mrb[0].mxu1 %vm43_vm0, %v229_v41 }
 0x12d   :  { %640 = vmatprep.mubr.msk.f32.mxu1 %vm752_vm2, %v753_v28 }
 0x132   :  { %684 = vmatpush3.bf16.xpose.msk.msra.mxu1 %vm799_vm1, %v682_v14  ;;  %v231_v14 = vstv %s1033_s4  ;;  %s731_s4 = scalar_lea.vmem %s460_s19, 32 }
 0x133   :  { %685 = vmatprep.subr.bf16.mxu1 %v751_v3  ;;  %p733_p2 = scmp.lt.s32.totalorder %s731_s4, %s727_s20 }
 0x135   :  { %p734_p3 = por %p733_p2, %p732_p1 }
 0x137   :  { %p735_p4 = pnand %p734_p3, %p728_p0 }
 0x13a   :  { %688 = vmatpush3.bf16.xpose.msk.msra.mxu1 %vm799_vm1, %v686_v18 }
 0x13b   :  { %689 = vmatprep.subr.bf16.mxu1 %v751_v3 }
 0x142   :  { %692 = vmatpush3.bf16.xpose.msk.msra.mxu1 %vm799_vm1, %v690_v23 }
 0x143   :  { %693 = vmatprep.subr.bf16.mxu1 %v751_v3 }
 0x14a   :  { %696 = vmatpush3.bf16.xpose.msk.msra.mxu1 %vm799_vm1, %v694_v29 }
 0x14b   :  { %697 = vmatprep.subr.bf16.mxu1 %v751_v3 }
 0x152   :  { %700 = vmatpush3.bf16.xpose.msk.msra.mxu1 %vm799_vm1, %v698_v36 }
 0x153   :  { %701 = vmatprep.subr.bf16.mxu1 %v751_v3 }
 0x15a   :  { %704 = vmatpush3.bf16.xpose.msk.msra.mxu1 %vm799_vm1, %v702_v42 }
 0x15b   :  { %705 = vmatprep.subr.bf16.mxu1 %v751_v3 }
 0x162   :  { %708 = vmatpush3.bf16.xpose.msk.msra.mxu1 %vm799_vm1, %v706_v45 }
 0x163   :  { %709 = vmatprep.subr.bf16.mxu1 %v751_v3 }
 0x16a   :  { %712 = vmatpush3.bf16.xpose.msk.msra.mxu1 %vm799_vm1, %v710_v47 }
 0x171   :  { %641 = vmatmul.mubr.msk.f32.vlgmr.msra.gmra.mrb[2].mxu1 %vm43_vm0, %v755_v6 }
 0x1ff   :  { %v301_v11 = vpop.f32.mrb[0].mxu1 }
 0x200   :  { %v607_v13 = vpop.f32.mrb[1].mxu1  ;;  %v302_v15 = vadd.f32 %v301_v11, %v231_v14 }
 0x202   :  { %v489_v18 = vmul.f32 -1.442695, %v302_v15 }
 0x204   :  { %721 = vpow2.f32 %v489_v18 }
 0x20e   :  { %v722_v3 = vpop.eup %721 }
 0x20f   :  { %v308_v20 = vadd.f32 1.0, %v722_v3 }
 0x244   :  { %v444_v19 = vpop.f32.mrb[2].mxu1 }
 0x245   :  { %v448_v23 = vmax.f32 %v444_v19, 1e-16  ;;  %v642_v5 = vpop.f32.mrb[3].mxu1 }
 0x247   :  { %723 = vrsqrt.f32 %v448_v23 }
 0x248   :  { %725 = vrcp.f32 %v308_v20 }
 0x251   :  { %v724_v24 = vpop.eup %723 }
 0x252   :  { %v450_v25 = vmul.f32 %v724_v24, %v193_v7  ;;  %v726_v28 = vpop.eup %725 }
 0x254   :  { %v451_v29 = vmul.f32 %v726_v28, %v450_v25 }
 0x256   :  { %452 = vst [vmem:[#allocation3] sm:$0x1] %v451_v29 }
 0x257   :  { %738 = shalt.err (!%p735_p4)
}
 0x258   :  { %s739_s23 = scalar_lea.hbm %s1034_s5, 16 }
 0x259   :  { %p740_p5 = scmp.ne.s32.totalorder %s1034_s5, %s739_s23  ;;  %p743_p6 = scmp.lt.u32.totalorder %s739_s23, %s1034_s5 }
 0x25b   :  { %p745_p7 = pnand %p743_p6, %p740_p5 }
 0x25d   :  { %748 = shalt.err (!%p745_p7)
}
 0x25e   :  { %462 = dma.vmem_to_hbm [thread:$0]  %s460_s19, 16, %s1034_s5, [#allocation4]  }
 0x25f   :  { %749 = dma.done.wait [#allocation4], 16  }
 0x260   :  { %750 = vsyncadd [#allocation4], 4294967280 }
 0x261   :  { %466 = vsyncpa [#allocation4], 1 }

</bundles_post_ra>
